<compile_context>
chip_gen: v7x
topology: tpu7x:2x2x1
jax: 0.10.0
libtpu: 0.0.40
codegen_flags: <defaults>
</compile_context>

<pallas_src>
import math
from functools import partial

import jax
import jax.numpy as jnp
from jax.experimental import pallas as pl
from jax.experimental.pallas import tpu as pltpu

_MB = 1024 * 1024


def _round_up(x: int, m: int) -> int:
    return (x + m - 1) // m * m


def _cdiv(a: int, b: int) -> int:
    return (a + b - 1) // b


def _vmem_capacity_bytes() -> int:
    try:
        return int(pltpu.get_tpu_info().vmem_capacity_bytes)
    except Exception:
        # Conservative fallback (v7x per-core size); the query normally succeeds
        # on real TPUs, where v5e/v6e report 128 MiB.
        return 64 * _MB


def _sublane_pack(dtype) -> int:
    # rows per packed 32-bit sublane: 8 (f32), 16 (bf16), 32 (int8/fp8)
    return max(8, 32 // jnp.dtype(dtype).itemsize)


# ------------------------------- kernels ------------------------------------


def _gelu_f32(h, approximate):
    if approximate:
        # tanh approximation: one EUP op per element (useful on v5e where the erf
        # polynomial can make the VPU the binding slot).
        c = jnp.float32(math.sqrt(2.0 / math.pi))
        return 0.5 * h * (1.0 + jnp.tanh(c * (h + 0.044715 * h * h * h)))
    inv_sqrt2 = jnp.float32(1.0 / math.sqrt(2.0))
    return 0.5 * h * (1.0 + jax.lax.erf(h * inv_sqrt2))


def _expert_kernel_resident(x_ref, w1_ref, b1_ref, w2_ref, b2_ref, o_ref, *,
                            approximate_gelu):
    """Weights fully VMEM-resident; 1-D grid over row tiles."""
    h = jnp.dot(x_ref[...], w1_ref[...], preferred_element_type=jnp.float32)
    h = h + b1_ref[...].astype(jnp.float32)
    h = _gelu_f32(h, approximate_gelu)
    # Dropout: module evaluated in inference mode -> identity.
    # TODO(synk): training-mode dropout would use pltpu.prng_seed/prng_random_bits.
    out = jnp.dot(h.astype(w2_ref.dtype), w2_ref[...],
                  preferred_element_type=jnp.float32)
    out = out + b2_ref[...].astype(jnp.float32)
    o_ref[...] = out.astype(o_ref.dtype)


def _expert_kernel_streamed(x_ref, w1_ref, b1_ref, w2_ref, b2_ref, o_ref,
                            acc_ref, *, approximate_gelu):
    """d_ff streamed in chunks (reduction grid axis); f32 VMEM accumulator."""
    k = pl.program_id(1)

    @pl.when(k == 0)
    def _():
        # Fold the second bias into the accumulator init (once per row tile).
        acc_ref[...] = jnp.broadcast_to(
            b2_ref[...].astype(jnp.float32), acc_ref.shape)

    h = jnp.dot(x_ref[...], w1_ref[...], preferred_element_type=jnp.float32)
    h = h + b1_ref[...].astype(jnp.float32)
    h = _gelu_f32(h, approximate_gelu)
    acc_ref[...] += jnp.dot(h.astype(w2_ref.dtype), w2_ref[...],
                            preferred_element_type=jnp.float32)

    @pl.when(k == pl.num_programs(1) - 1)
    def _():
        o_ref[...] = acc_ref[...].astype(o_ref.dtype)


# --------------------------- tile planning ----------------------------------


def _plan(M, d_model, d_ff, act_isz, w_isz, force_streamed):
    cap = _vmem_capacity_bytes()
    budget = int(cap * 0.70)          # per-step residency target
    pack = max(8, 32 // act_isz)

    def row_tile_cap():
        tm = min(1024, _round_up(M, pack))
        # Keep >=2 row tiles when there are enough rows, so the "parallel" M axis
        # can shard across v7x's two TensorCores (harmless on single-core chips).
        if M > 256:
            tm = min(tm, _round_up(_cdiv(M, 2), 256))
        return max(pack, tm)

    weights_bytes = 2 * d_model * d_ff * w_isz

    # ---------- resident-weights plan (no k axis, weights DMA'd once) -------
    if (not force_streamed) and weights_bytes <= int(budget * 0.40):
        per_row = (4 * d_model * act_isz         # x + out tiles, double-buffered
                   + d_ff * 4 + d_ff * w_isz)    # f32 GELU intermediate + recast
        tm = row_tile_cap()
        while tm > pack and 2 * weights_bytes + tm * per_row > budget:
            tm = max(pack, _round_up(tm // 2, pack))
        if 2 * weights_bytes + tm * per_row <= budget:
            return dict(mode="resident", tm=tm, cap=cap)

    # ---------- streamed plan (grid = (row tiles, d_ff chunks)) -------------
    if d_ff < 128:
        tk_options = (d_ff,)                     # single full-width chunk
    else:
        dff128 = _round_up(d_ff, 128)
        tk_options = tuple(t for t in (512, 256, 128) if t <= dff128) or (128,)

    def step_bytes(tm, tk, wbuf):
        return (4 * tm * d_model * act_isz                  # x + out, double-buffered
                + tm * d_model * 4                           # f32 accumulator scratch
                + wbuf * (2 * d_model * tk + tk) * w_isz     # W1/W2/b1 chunk buffers
                + tm * tk * (4 + w_isz))                     # GELU intermediate (+recast)

    tm = row_tile_cap()
    choice = None
    while True:
        for tk in tk_options:                # prefer large tk (flops/weight-byte)
            for wbuf in (3, 2):              # prefer deeper weight buffering
                if step_bytes(tm, tk, wbuf) <= budget:
                    choice = (tm, tk, wbuf)
                    break
            if choice:
                break
        if choice or tm <= pack:
            break
        tm = max(pack, _round_up(tm // 2, pack))   # shrink rows only as last resort
    if choice is None:
        choice = (pack, tk_options[-1], 2)
    tm, tk, wbuf = choice
    return dict(mode="streamed", tm=tm, tk=tk, wbuf=wbuf, cap=cap)


def _weight_chunk_spec(block_shape, index_map, wbuf, grid_k):
    """BlockSpec for a streamed weight chunk, 3-deep buffered when worthwhile."""
    if wbuf >= 3 and grid_k >= 3:
        try:
            return pl.BlockSpec(block_shape, index_map,
                                pipeline_mode=pl.Buffered(wbuf))
        except (TypeError, AttributeError):
            pass  # older jax without pipeline_mode / Buffered — fall back
    return pl.BlockSpec(block_shape, index_map)


# ------------------------------ wrapper -------------------------------------


@partial(jax.jit,
         static_argnames=("use_bf16_matmul", "approximate_gelu",
                          "_force_streamed"))
def expert_forward(x, w1, b1, w2, b2, *, use_bf16_matmul=False,
                   approximate_gelu=False, _force_streamed=False):
    """Fused Expert forward: x[..., d_model] -> [..., d_model].

    Weights are stored pre-transposed vs torch.nn.Linear:
      w1: [d_model, d_ff], b1: [d_ff], w2: [d_ff, d_model], b2: [d_model].
    use_bf16_matmul=True (explicit opt-in) casts x/W1/W2 to bf16 before the MXU
    while keeping f32 accumulation — halves weight-streaming bytes and avoids
    the slow f32 MXU path.
    """
    orig_shape = x.shape
    out_dtype = x.dtype
    d_model = orig_shape[-1]
    d_ff = w1.shape[1]

    if use_bf16_matmul:
        x = x.astype(jnp.bfloat16)
        w1 = w1.astype(jnp.bfloat16)
        w2 = w2.astype(jnp.bfloat16)

    x2d = x.reshape(-1, d_model)
    M = x2d.shape[0]
    act_isz = jnp.dtype(x2d.dtype).itemsize
    w_isz = jnp.dtype(w1.dtype).itemsize

    plan = _plan(M, d_model, d_ff, act_isz, w_isz, _force_streamed)
    tm = plan["tm"]

    M_pad = _round_up(M, tm)
    if M_pad != M:
        x2d = jnp.pad(x2d, ((0, M_pad - M), (0, 0)))
    n_row_tiles = M_pad // tm

    b2_2d = b2.reshape(1, d_model)
    vmem_limit = min(int(plan["cap"] * 0.85), 112 * _MB)

    if plan["mode"] == "resident":
        b1_2d = b1.reshape(1, d_ff)
        cost = pl.CostEstimate(
            flops=2 * 2 * M * d_model * d_ff,
            transcendentals=M * d_ff,
            bytes_accessed=(2 * M_pad * d_model * act_isz
                            + (w1.size + w2.size) * w_isz
                            + b1_2d.size * jnp.dtype(b1_2d.dtype).itemsize
                            + b2_2d.size * jnp.dtype(b2_2d.dtype).itemsize),
        )
        out = pl.pallas_call(
            partial(_expert_kernel_resident, approximate_gelu=approximate_gelu),
            out_shape=jax.ShapeDtypeStruct((M_pad, d_model), out_dtype),
            grid_spec=pltpu.PrefetchScalarGridSpec(
                num_scalar_prefetch=0,
                grid=(n_row_tiles,),
                in_specs=[
                    pl.BlockSpec((tm, d_model), lambda i: (i, 0)),       # x row tile
                    pl.BlockSpec((d_model, d_ff), lambda i: (0, 0)),     # W1 (resident)
                    pl.BlockSpec((1, d_ff), lambda i: (0, 0)),           # b1 (resident)
                    pl.BlockSpec((d_ff, d_model), lambda i: (0, 0)),     # W2 (resident)
                    pl.BlockSpec((1, d_model), lambda i: (0, 0)),        # b2 (resident)
                ],
                out_specs=pl.BlockSpec((tm, d_model), lambda i: (i, 0)),
            ),
            compiler_params=pltpu.CompilerParams(
                dimension_semantics=("parallel",),
                vmem_limit_bytes=vmem_limit,
            ),
            cost_estimate=cost,
        )(x2d, w1, b1_2d, w2, b2_2d)
    else:
        tk = plan["tk"]
        wbuf = plan["wbuf"]
        dff_pad = _round_up(d_ff, tk)
        if dff_pad != d_ff:
            # zero padding is exact: gelu(0 + 0) = 0 and padded W2 rows are zero
            w1 = jnp.pad(w1, ((0, 0), (0, dff_pad - d_ff)))
            b1 = jnp.pad(b1, ((0, dff_pad - d_ff),))
            w2 = jnp.pad(w2, ((0, dff_pad - d_ff), (0, 0)))
        b1_2d = b1.reshape(1, dff_pad)
        grid_k = dff_pad // tk

        cost = pl.CostEstimate(
            flops=2 * 2 * M * d_model * d_ff,
            transcendentals=M * d_ff,
            # weights (and b1) are re-streamed once per row tile in this plan
            bytes_accessed=(2 * M_pad * d_model * act_isz
                            + n_row_tiles * (w1.size + w2.size) * w_isz
                            + n_row_tiles * b1_2d.size * jnp.dtype(b1_2d.dtype).itemsize
                            + b2_2d.size * jnp.dtype(b2_2d.dtype).itemsize),
        )
        out = pl.pallas_call(
            partial(_expert_kernel_streamed, approximate_gelu=approximate_gelu),
            out_shape=jax.ShapeDtypeStruct((M_pad, d_model), out_dtype),
            grid_spec=pltpu.PrefetchScalarGridSpec(
                num_scalar_prefetch=0,
                grid=(n_row_tiles, grid_k),
                in_specs=[
                    pl.BlockSpec((tm, d_model), lambda i, k: (i, 0)),              # x
                    _weight_chunk_spec((d_model, tk), lambda i, k: (0, k),
                                       wbuf, grid_k),                              # W1 chunk
                    pl.BlockSpec((1, tk), lambda i, k: (0, k)),                    # b1 chunk
                    _weight_chunk_spec((tk, d_model), lambda i, k: (k, 0),
                                       wbuf, grid_k),                              # W2 chunk
                    pl.BlockSpec((1, d_model), lambda i, k: (0, 0)),               # b2
                ],
                out_specs=pl.BlockSpec((tm, d_model), lambda i, k: (i, 0)),
                scratch_shapes=[pltpu.VMEM((tm, d_model), jnp.float32)],
            ),
            compiler_params=pltpu.CompilerParams(
                dimension_semantics=("parallel", "arbitrary"),
                vmem_limit_bytes=vmem_limit,
            ),
            cost_estimate=cost,
        )(x2d, w1, b1_2d, w2, b2_2d)

    return out[:M].reshape(orig_shape)


# --------------------------- reference & init --------------------------------


def init_expert_params(key, d_model, d_ff, dtype=jnp.float32):
    """Deterministic synthetic init (uniform, torch-Linear-like scale)."""
    k1, k2, k3, k4 = jax.random.split(key, 4)
    lim1 = 1.0 / math.sqrt(d_model)
    lim2 = 1.0 / math.sqrt(d_ff)
    # Stored transposed vs torch: w1: [d_model, d_ff], w2: [d_ff, d_model]
    w1 = jax.random.uniform(k1, (d_model, d_ff), dtype, minval=-lim1, maxval=lim1)
    b1 = jax.random.uniform(k2, (d_ff,), dtype, minval=-lim1, maxval=lim1)
    w2 = jax.random.uniform(k3, (d_ff, d_model), dtype, minval=-lim2, maxval=lim2)
    b2 = jax.random.uniform(k4, (d_model,), dtype, minval=-lim2, maxval=lim2)
    return w1, b1, w2, b2


def expert_reference(x, w1, b1, w2, b2):
    h = x.astype(jnp.float32) @ w1.astype(jnp.float32) + b1.astype(jnp.float32)
    h = 0.5 * h * (1.0 + jax.lax.erf(h / jnp.sqrt(jnp.float32(2.0))))
    return (h @ w2.astype(jnp.float32) + b2.astype(jnp.float32)).astype(x.dtype)


if __name__ == "__main__":
    key = jax.random.PRNGKey(0)
    kx, kp, kp2 = jax.random.split(key, 3)

    # --- case 1: small shapes, resident-weights plan (weights fit in VMEM) ---
    batch, seq, d_model, d_ff = 2, 8, 32, 64
    x = jax.random.normal(kx, (batch, seq, d_model), jnp.float32)
    w1, b1, w2, b2 = init_expert_params(kp, d_model, d_ff)
    ref = expert_reference(x, w1, b1, w2, b2)

    out = jax.block_until_ready(expert_forward(x, w1, b1, w2, b2))
    assert out.shape == (batch, seq, d_model)
    assert jnp.allclose(out, ref, atol=1e-5, rtol=1e-5), "resident path mismatch"

    # --- case 2: same shapes, forced d_ff-streamed plan ----------------------
    out_s = jax.block_until_ready(
        expert_forward(x, w1, b1, w2, b2, _force_streamed=True))
    assert jnp.allclose(out_s, ref, atol=1e-5, rtol=1e-5), "streamed path mismatch"

    # --- case 3: multi-chunk streamed plan (exercises k accumulation + d_ff pad) ---
    d_model2, d_ff2 = 128, 1536
    x2 = jax.random.normal(kx, (batch, seq, d_model2), jnp.float32)
    p2 = init_expert_params(kp2, d_model2, d_ff2)
    ref2 = expert_reference(x2, *p2)
    out2 = jax.block_until_ready(
        expert_forward(x2, *p2, _force_streamed=True))
    assert out2.shape == (batch, seq, d_model2)
    assert jnp.allclose(out2, ref2, atol=1e-4, rtol=1e-4), "multi-chunk mismatch"

    # --- case 4: explicit bf16 matmul option (looser tolerance) --------------
    out_bf = jax.block_until_ready(
        expert_forward(x, w1, b1, w2, b2, use_bf16_matmul=True))
    assert jnp.allclose(out_bf, ref, atol=5e-2, rtol=5e-2), "bf16 path mismatch"

    print("KERNEL_OK")
</pallas_src>

<mosaic_0001>
module attributes {stable_mosaic.version = 11 : i64} {
  func.func @_expert_kernel_resident(%arg0: i32, %arg1: memref<16x32xf32, #tpu.memory_space<vmem>>, %arg2: memref<32x64xf32, #tpu.memory_space<vmem>>, %arg3: memref<1x64xf32, #tpu.memory_space<vmem>>, %arg4: memref<64x32xf32, #tpu.memory_space<vmem>>, %arg5: memref<1x32xf32, #tpu.memory_space<vmem>>, %arg6: memref<16x32xf32, #tpu.memory_space<vmem>>) attributes {dimension_semantics = [#tpu.dimension_semantics<parallel>], iteration_bounds = array<i64: 1>, scalar_prefetch = 0 : i64, scratch_operands = 0 : i64, tpu.core_type = #tpu.core_type<tc>, window_params = [{transform_indices = @transform_0, window_bounds = array<i64: 16, 32>}, {pipeline_mode = #tpu.pipeline_mode<synchronous>, transform_indices = @transform_1, window_bounds = array<i64: 32, 64>}, {pipeline_mode = #tpu.pipeline_mode<synchronous>, transform_indices = @transform_2, window_bounds = array<i64: 1, 64>}, {pipeline_mode = #tpu.pipeline_mode<synchronous>, transform_indices = @transform_3, window_bounds = array<i64: 64, 32>}, {pipeline_mode = #tpu.pipeline_mode<synchronous>, transform_indices = @transform_4, window_bounds = array<i64: 1, 32>}, {transform_indices = @transform_5, window_bounds = array<i64: 16, 32>}]} {
    %c0 = arith.constant 0 : index
    %c0_0 = arith.constant 0 : index
    %0 = vector.load %arg1[%c0, %c0_0] : memref<16x32xf32, #tpu.memory_space<vmem>>, vector<16x32xf32>
    %c0_1 = arith.constant 0 : index
    %c0_2 = arith.constant 0 : index
    %1 = vector.load %arg2[%c0_1, %c0_2] : memref<32x64xf32, #tpu.memory_space<vmem>>, vector<32x64xf32>
    %cst = arith.constant dense<0.000000e+00> : vector<16x64xf32>
    %2 = tpu.matmul %0, %1, %cst {dimension_numbers = #tpu.dot_dimension_numbers<[1], [0], [0], [1], [0, 0, 1, 1], [], []>} : vector<16x32xf32>, vector<32x64xf32>, vector<16x64xf32> -> vector<16x64xf32>
    %c0_3 = arith.constant 0 : index
    %c0_4 = arith.constant 0 : index
    %3 = vector.load %arg3[%c0_3, %c0_4] : memref<1x64xf32, #tpu.memory_space<vmem>>, vector<1x64xf32>
    %4 = vector.broadcast %3 : vector<1x64xf32> to vector<16x64xf32>
    %5 = arith.addf %2, %4 : vector<16x64xf32>
    %cst_5 = arith.constant 5.000000e-01 : f32
    %6 = vector.broadcast %cst_5 : f32 to vector<16x64xf32>
    %7 = arith.mulf %6, %5 : vector<16x64xf32>
    %cst_6 = arith.constant 0.707106769 : f32
    %8 = vector.broadcast %cst_6 : f32 to vector<16x64xf32>
    %9 = arith.mulf %5, %8 : vector<16x64xf32>
    %10 = math.erf %9 : vector<16x64xf32>
    %cst_7 = arith.constant 1.000000e+00 : f32
    %11 = vector.broadcast %cst_7 : f32 to vector<16x64xf32>
    %12 = arith.addf %11, %10 : vector<16x64xf32>
    %13 = arith.mulf %7, %12 : vector<16x64xf32>
    %c0_8 = arith.constant 0 : index
    %c0_9 = arith.constant 0 : index
    %14 = vector.load %arg4[%c0_8, %c0_9] : memref<64x32xf32, #tpu.memory_space<vmem>>, vector<64x32xf32>
    %cst_10 = arith.constant dense<0.000000e+00> : vector<16x32xf32>
    %15 = tpu.matmul %13, %14, %cst_10 {dimension_numbers = #tpu.dot_dimension_numbers<[1], [0], [0], [1], [0, 0, 1, 1], [], []>} : vector<16x64xf32>, vector<64x32xf32>, vector<16x32xf32> -> vector<16x32xf32>
    %c0_11 = arith.constant 0 : index
    %c0_12 = arith.constant 0 : index
    %16 = vector.load %arg5[%c0_11, %c0_12] : memref<1x32xf32, #tpu.memory_space<vmem>>, vector<1x32xf32>
    %17 = vector.broadcast %16 : vector<1x32xf32> to vector<16x32xf32>
    %18 = arith.addf %15, %17 : vector<16x32xf32>
    %c0_13 = arith.constant 0 : index
    %c0_14 = arith.constant 0 : index
    %19 = vector.load %arg6[%c0_13, %c0_14] : memref<16x32xf32, #tpu.memory_space<vmem>>, vector<16x32xf32>
    tpu.vector_store %arg6[%c0_13, %c0_14], %18 {strides = array<i32>} : memref<16x32xf32, #tpu.memory_space<vmem>>, vector<16x32xf32>,
    return
  }
  func.func @transform_0(%arg0: i32) -> (i32, i32) {
    %c0_i32 = arith.constant 0 : i32
    %c0_i32_0 = arith.constant 0 : i32
    return %arg0, %c0_i32 : i32, i32
  }
  func.func @transform_1(%arg0: i32) -> (i32, i32) {
    %c0_i32 = arith.constant 0 : i32
    %c0_i32_0 = arith.constant 0 : i32
    %c0_i32_1 = arith.constant 0 : i32
    return %c0_i32, %c0_i32_0 : i32, i32
  }
  func.func @transform_2(%arg0: i32) -> (i32, i32) {
    %c0_i32 = arith.constant 0 : i32
    %c0_i32_0 = arith.constant 0 : i32
    %c0_i32_1 = arith.constant 0 : i32
    return %c0_i32, %c0_i32_0 : i32, i32
  }
  func.func @transform_3(%arg0: i32) -> (i32, i32) {
    %c0_i32 = arith.constant 0 : i32
    %c0_i32_0 = arith.constant 0 : i32
    %c0_i32_1 = arith.constant 0 : i32
    return %c0_i32, %c0_i32_0 : i32, i32
  }
  func.func @transform_4(%arg0: i32) -> (i32, i32) {
    %c0_i32 = arith.constant 0 : i32
    %c0_i32_0 = arith.constant 0 : i32
    %c0_i32_1 = arith.constant 0 : i32
    return %c0_i32, %c0_i32_0 : i32, i32
  }
  func.func @transform_5(%arg0: i32) -> (i32, i32) {
    %c0_i32 = arith.constant 0 : i32
    %c0_i32_0 = arith.constant 0 : i32
    return %arg0, %c0_i32 : i32, i32
  }
}

</mosaic_0001>

<bundles_post_ra>
// kernel: expert_forward.1
= control target key start
LH: loop header
LB: loop body
LE: loop exit
PB: predicated region body
PF: predicated region fallthrough
CT: control target
= control target key end

     0   :  { %vm34_vm0 = vcmask 261120   ;;  %s445_s0 = inlined_call_operand.vmem [shape: f32[16,32], index: 0, kind: input, shape index: {}]   ;;  %s446_s1 = inlined_call_operand.vmem [shape: f32[32,64], index: 1, kind: input, shape index: {}]   ;;  %s447_s2 = inlined_call_operand.vmem [shape: f32[1,64], index: 2, kind: input, shape index: {}]   ;;  %s448_s3 = inlined_call_operand.vmem [shape: f32[64,32], index: 3, kind: input, shape index: {}]   ;;  %s449_s4 = inlined_call_operand.vmem [shape: f32[1,32], index: 4, kind: input, shape index: {}]   ;;  %s450_s5 = inlined_call_operand.hbm [shape: f32[16,32], index: 5, kind: output, shape index: {}]  }
   0x1   :  { %v23_v0 = vld [vmem:[%s446_s1] sm:$0xff]  ;;  %v24_v1 = vld [vmem:[%s446_s1 + $0x8] sm:$0xff]  ;;  %v25_v2 = vld [vmem:[%s446_s1 + $0x10] sm:$0xff] }
   0x2   :  { %v293_v3 = vpack.c.bf16 %v24_v1, %v23_v0  ;;  %v26_v4 = vld [vmem:[%s446_s1 + $0x18] sm:$0xff]  ;;  %v21_v5 = vld [vmem:[%s445_s0] sm:$0xff] }
   0x3   :  { %v297_v6 = vpack.c.bf16 %v26_v4, %v25_v2  ;;  %271 = vmatprep.mubr.msk.f32.mxu0 %vm34_vm0, %v21_v5 }
   0x4   :  { %10 = vsyncpa [#allocation3], 0  ;;  %294 = vmatprep.subr.bf16.mxu0 %v293_v3  ;;  %v22_v7 = vld [vmem:[%s445_s0 + $0x8] sm:$0xff]  ;;  %v126_v8 = vld [vmem:[%s448_s3] sm:$0xff]  ;;  %vm141_vm1 = vcmask 523264   ;;  %s348_s21 = smov [#allocation2]  }
   0x5   :  { %296 = vmatpush3.bf16.msra.mxu0 %v293_v3  ;;  %v127_v9 = vld [vmem:[%s448_s3 + $0x8] sm:$0xff]  ;;  %v128_v11 = vld [vmem:[%s448_s3 + $0x10] sm:$0xff]  ;;  %v129_v12 = vld [vmem:[%s448_s3 + $0x18] sm:$0xff]  ;;  %s230_s22 = sshll.u32 %s348_s21, 4  ;;  %s231_s22 = int_to_ptr.vmem [resolvable:$true] %s230_s22 }
   0x6   :  { %298 = vmatprep.subr.bf16.mxu0 %v297_v6  ;;  %v301_v10 = vpack.c.bf16 %v127_v9, %v126_v8  ;;  %v305_v13 = vpack.c.bf16 %v129_v12, %v128_v11  ;;  %v130_v14 = vld [vmem:[%s448_s3 + $0x20] sm:$0xff]  ;;  %v131_v15 = vld [vmem:[%s448_s3 + $0x28] sm:$0xff]  ;;  %v132_v17 = vld [vmem:[%s448_s3 + $0x30] sm:$0xff]  ;;  %s324_s23 = scalar_lea.vmem %s231_s22, 256  ;;  %p329_p1 = scmp.lt.s32.totalorder %s231_s22, %s231_s22 }
   0x7   :  { %v309_v16 = vpack.c.bf16 %v131_v15, %v130_v14  ;;  %v133_v18 = vld [vmem:[%s448_s3 + $0x38] sm:$0xff]  ;;  %v241_v20 = vld [vmem:[%s447_s2] ss:$0 sm:$0xff]  ;;  %p325_p0 = scmp.ne.s32.totalorder %s231_s22, %s324_s23  ;;  %p330_p2 = scmp.lt.s32.totalorder %s324_s23, %s324_s23 }
   0x8   :  { %302 = vmatprep.subr.bf16.mxu1 %v301_v10  ;;  %v313_v19 = vpack.c.bf16 %v133_v18, %v132_v17  ;;  %v244_v35 = vld [vmem:[%s449_s4] ss:$0 sm:$0xff] }
   0x9   :  { %300 = vmatpush3.bf16.msra.mxu0 %v297_v6  ;;  %304 = vmatpush3.bf16.msra.mxu1 %v301_v10  ;;  %p331_p3 = por %p330_p2, %p329_p1 }
   0xa   :  { %306 = vmatprep.subr.bf16.mxu1 %v305_v13 }
   0xb   :  { %p332_p4 = pnand %p331_p3, %p325_p0 }
   0xc   :  { %272 = vmatmul.mubr.msk.f32.vlgmr.msra.gmra.mrb[0].mxu0 %vm34_vm0, %v22_v7 }
   0xd   :  { %308 = vmatpush3.bf16.msra.mxu1 %v305_v13 }
   0xe   :  { %310 = vmatprep.subr.bf16.mxu1 %v309_v16 }
  0x11   :  { %312 = vmatpush3.bf16.msra.mxu1 %v309_v16 }
  0x12   :  { %314 = vmatprep.subr.bf16.mxu1 %v313_v19 }
  0x15   :  { %316 = vmatpush3.bf16.msra.mxu1 %v313_v19 }
  0xdf   :  { %v273_v21 = vpop.f32.mrb[0].mxu0 }
  0xe0   :  { %v113_v22 = vadd.f32 %v273_v21, %v241_v20  ;;  %v107_v23 = vpop.f32.mrb[1].mxu0 }
  0xe1   :  { %v108_v24 = vadd.f32 %v241_v20, %v107_v23 }
  0xe2   :  { %v119_v25 = vmul.f32 0.70710677, %v113_v22  ;;  %v117_v32 = vmul.f32 0.5, %v113_v22 }
  0xe3   :  { %v118_v26 = vmul.f32 0.70710677, %v108_v24  ;;  %v116_v30 = vmul.f32 0.5, %v108_v24 }
  0xe4   :  { %320 = verf.f32 %v119_v25 }
  0xe5   :  { %322 = verf.f32 %v118_v26 }
  0xee   :  { %v321_v27 = vpop.eup %320 }
  0xef   :  { %v323_v28 = vpop.eup %322  ;;  %v123_v29 = vadd.f32 1.0, %v321_v27 }
  0xf0   :  { %v122_v31 = vadd.f32 1.0, %v323_v28 }
  0xf1   :  { %v125_v34 = vmul.f32 %v123_v29, %v117_v32 }
  0xf2   :  { %v124_v33 = vmul.f32 %v122_v31, %v116_v30 }
  0xf4   :  { %290 = vmatprep.mubr.msk.f32.mxu1 %vm141_vm1, %v124_v33 }
  0xf5   :  { %291 = vmatmul.mubr.msk.f32.vlgmr.msra.gmra.mrb[0].mxu1 %vm141_vm1, %v125_v34 }
 0x1c8   :  { %v292_v36 = vpop.f32.mrb[0].mxu1 }
 0x1c9   :  { %v220_v37 = vadd.f32 %v292_v36, %v244_v35  ;;  %v214_v38 = vpop.f32.mrb[1].mxu1 }
 0x1ca   :  { %v215_v39 = vadd.f32 %v244_v35, %v214_v38 }
 0x1cb   :  { %224 = vst.msk [vmem:[#allocation2 + $0x8] sm:$0xff] %vm34_vm0, %v220_v37 }
 0x1cc   :  { %223 = vst.msk [vmem:[#allocation2] sm:$0xff] %vm34_vm0, %v215_v39 }
 0x1cd   :  { %335 = shalt.err (!%p332_p4)
}
 0x1ce   :  { %s336_s25 = scalar_lea.hbm %s450_s5, 256 }
 0x1cf   :  { %p337_p5 = scmp.ne.s32.totalorder %s450_s5, %s336_s25  ;;  %p340_p6 = scmp.lt.u32.totalorder %s336_s25, %s450_s5 }
 0x1d1   :  { %p342_p7 = pnand %p340_p6, %p337_p5 }
 0x1d3   :  { %345 = shalt.err (!%p342_p7)
}
 0x1d4   :  { %s349_s30 = smov 128   ;;  %s350_s1 = smov 8  }
 0x1d5   :  { %236 = dma.vmem_to_hbm [thread:$0]  %s231_s22, 256, %s450_s5, [#allocation3], %s349_s30, %s349_s30, %s350_s1  }
 0x1d6   :  { %346 = dma.done.wait [#allocation3], 256  }
 0x1d7   :  { %347 = vsyncadd [#allocation3], 4294967040 }
 0x1d8   :  { %240 = vsyncpa [#allocation3], 1 }

</bundles_post_ra>
